<compile_context>
chip_gen: v5e
topology: v5e:2x2
jax: 0.10.0
libtpu: 0.0.40
codegen_flags: <defaults>
</compile_context>

<pallas_src>
import functools

import jax
import jax.numpy as jnp
import numpy as np
from jax import lax
from jax.experimental import pallas as pl
from jax.experimental.pallas import tpu as pltpu


# ---------------------------------------------------------------------------
# Small helpers
# ---------------------------------------------------------------------------

def _cdiv(a, b):
    return -(-a // b)


def _round_up(x, m):
    return ((x + m - 1) // m) * m


def _sublane_multiple(itemsize):
    # sub-32-bit dtypes pack along sublanes: 8 rows for f32, 16 for bf16, 32 for int8
    return 8 * max(1, 4 // int(itemsize))


def _largest_divisor_le(n, cap):
    cap = max(1, min(n, cap))
    for d in range(cap, 0, -1):
        if n % d == 0:
            return d
    return 1


def _tpu_vmem_capacity_bytes():
    try:
        return int(pltpu.get_tpu_info().vmem_capacity_bytes)
    except Exception:
        return 64 * 1024 * 1024   # conservative default (v7x per-TensorCore VMEM)


def _pack3(a, b, c):
    """Pack three scalars into a lane-dense (1, 128) f32 vector (slots 0, 1, 2)."""
    lanes = lax.broadcasted_iota(jnp.int32, (1, 128), 1)
    out = jnp.where(lanes == 0, a, 0.0)
    out = jnp.where(lanes == 1, b, out)
    out = jnp.where(lanes == 2, c, out)
    return out.astype(jnp.float32)


# ---------------------------------------------------------------------------
# Shared in-kernel VICReg statistics on (N, C) f32 feature matrices
# ---------------------------------------------------------------------------

def _vicreg_stats(f1, f2, *, min_var, eps):
    """Returns (inv_loss, var_loss, cov_loss_raw); cov adjustment is applied by the caller."""
    n, c = f1.shape
    inv_nm1 = 1.0 / float(n - 1)

    def one(f):
        mean0 = jnp.mean(f, axis=0, keepdims=True)                  # (1, C)
        xc = f - mean0                                               # (N, C), shared
        var = jnp.sum(xc * xc, axis=0, keepdims=True) * inv_nm1      # unbiased == diag(cov)
        reg_std = jnp.sqrt(var + eps)
        var_loss = jnp.mean(jnp.maximum(min_var - reg_std, 0.0))
        if n <= c:
            # Gram trick: sum(cov^2) = ||Xc Xc^T||_F^2 / (n-1)^2 (trace-cyclic identity).
            # Contracts the large, lane-aligned C axis on the MXU and only materializes
            # an (N, N) intermediate -- never C x C.
            gram = lax.dot_general(
                xc, xc,
                dimension_numbers=(((1,), (1,)), ((), ())),
                preferred_element_type=jnp.float32)
            sum_cov_sq = jnp.sum(gram * gram) * (inv_nm1 * inv_nm1)
            # NOTE: diagonal subtraction can cancel when the diagonal dominates; validated
            # against the masked-diagonal reference in the self-test.
            cov_loss = (sum_cov_sq - jnp.sum(var * var)) / float(c)
        else:
            cov = lax.dot_general(
                xc, xc,
                dimension_numbers=(((0,), (0,)), ((), ())),
                preferred_element_type=jnp.float32) * inv_nm1        # (C, C), small here
            row = lax.broadcasted_iota(jnp.int32, (c, c), 0)
            col = lax.broadcasted_iota(jnp.int32, (c, c), 1)
            off = jnp.where(row == col, 0.0, cov)
            cov_loss = jnp.sum(off * off) / float(c)
        return var_loss, cov_loss

    v1, c1 = one(f1)
    v2, c2 = one(f2)
    diff = f1 - f2
    inv_loss = jnp.sum(diff * diff) / float(n * c)
    return inv_loss, (v1 + v2) * 0.5, (c1 + c2) * 0.5


# ---------------------------------------------------------------------------
# Kernel 1: streaming spatial-sum over (B, C, S) -> (B, C) f32 sums
# ---------------------------------------------------------------------------

def _spatial_sum_kernel(x1_ref, x2_ref, o1_ref, o2_ref, *, s_total, needs_mask):
    s = pl.program_id(1)

    @pl.when(s == 0)
    def _init():
        o1_ref[...] = jnp.zeros_like(o1_ref)
        o2_ref[...] = jnp.zeros_like(o2_ref)

    _, _, ts = x1_ref.shape

    def _accum(mask_tail):
        x1 = x1_ref[...].astype(jnp.float32)
        x2 = x2_ref[...].astype(jnp.float32)
        if mask_tail:
            lane = lax.broadcasted_iota(jnp.int32, (1, 1, ts), 2)
            valid = (s * ts + lane) < s_total
            x1 = jnp.where(valid, x1, 0.0)
            x2 = jnp.where(valid, x2, 0.0)
        # per-tile cross-lane reduce (XLU slot; free under the HBM-bound regime)
        o1_ref[...] += jnp.sum(x1, axis=-1)[None]
        o2_ref[...] += jnp.sum(x2, axis=-1)[None]

    if needs_mask:
        last = pl.num_programs(1) - 1

        @pl.when(s != last)
        def _body():
            _accum(False)

        @pl.when(s == last)
        def _tail():
            _accum(True)
    else:
        _accum(False)


def _choose_tiles(B, C, S, itemsize, budget):
    c_pad = _round_up(C, _sublane_multiple(itemsize))
    per_lane = 2 * 2 * c_pad * itemsize              # 2 inputs x 2 pipeline buffers, per (row, lane)
    # Budget-limited tile_b at the minimum (128-lane) tile size.
    tb_budget = max(1, budget // max(per_lane * 128, 1))
    # Target >= 2 blocks along B: leading grid axis is "parallel" -> both v7x TensorCores.
    tb_target = max(1, B // 2) if B >= 2 else 1
    tile_b = _largest_divisor_le(B, min(tb_budget, tb_target))
    # Largest 128-aligned lane tile that fits the remaining budget.
    tile_s = budget // max(per_lane * tile_b, 1)
    tile_s = max(128, (tile_s // 128) * 128)
    if tile_s >= _round_up(S, 128):
        tile_s = S                                    # single step, no tail mask
    return tile_b, tile_s


def _spatial_mean_pallas(x1, x2, *, tile_b=None, tile_s=None):
    """Spatial means of two (B, C, S) arrays -> two (B, C) f32 arrays (Pallas streaming)."""
    assert x1.shape == x2.shape and x1.ndim == 3
    B, C, S = x1.shape
    itemsize = x1.dtype.itemsize

    cap = _tpu_vmem_capacity_bytes()
    budget = (cap * 3) // 4                           # ~96 MiB on v5e/v6e, ~48 MiB on v7x

    auto_tb, auto_ts = _choose_tiles(B, C, S, itemsize, budget)
    tile_b = auto_tb if tile_b is None else int(tile_b)
    tile_s = auto_ts if tile_s is None else int(tile_s)
    assert B % tile_b == 0, "tile_b must divide B"
    if tile_s != S:
        assert tile_s % 128 == 0, "tile_s must be a multiple of 128 (or equal S)"

    n_b = B // tile_b
    n_steps = _cdiv(S, tile_s)
    needs_mask = (n_steps * tile_s) != S

    # Working set (with layout padding) drives vmem_limit_bytes; no epilogue lives here.
    c_pad = _round_up(C, _sublane_multiple(itemsize))
    ts_pad = _round_up(tile_s, 128)
    in_bytes = 2 * 2 * tile_b * c_pad * ts_pad * itemsize
    out_bytes = 2 * 2 * _round_up(tile_b, 8) * _round_up(C, 128) * 4
    ws = in_bytes + out_bytes + (2 << 20)
    vmem_limit = int(min(cap, max(ws + (4 << 20), 16 << 20)))

    kern = functools.partial(_spatial_sum_kernel, s_total=S, needs_mask=needs_mask)

    s1, s2 = pl.pallas_call(
        kern,
        out_shape=(jax.ShapeDtypeStruct((n_b, tile_b, C), jnp.float32),
                   jax.ShapeDtypeStruct((n_b, tile_b, C), jnp.float32)),
        grid_spec=pltpu.PrefetchScalarGridSpec(
            num_scalar_prefetch=0,
            grid=(n_b, n_steps),
            in_specs=[pl.BlockSpec((tile_b, C, tile_s), lambda b, s: (b, 0, s)),
                      pl.BlockSpec((tile_b, C, tile_s), lambda b, s: (b, 0, s))],
            out_specs=[pl.BlockSpec((1, tile_b, C), lambda b, s: (b, 0, 0)),
                       pl.BlockSpec((1, tile_b, C), lambda b, s: (b, 0, 0))]),
        compiler_params=pltpu.CompilerParams(
            dimension_semantics=("parallel", "arbitrary"),
            vmem_limit_bytes=vmem_limit),
    )(x1, x2)

    inv_s = 1.0 / float(S)
    f1 = s1.reshape(B, C) * inv_s
    f2 = s2.reshape(B, C) * inv_s
    return f1, f2


# ---------------------------------------------------------------------------
# Kernel 2: VICReg stats on 2-D feature matrices (N, C)
# ---------------------------------------------------------------------------

def _vicreg_feat_kernel(f1_ref, f2_ref, out_ref, *, min_var, eps):
    f1 = f1_ref[...].astype(jnp.float32)
    f2 = f2_ref[...].astype(jnp.float32)
    inv_l, var_l, cov_l = _vicreg_stats(f1, f2, min_var=min_var, eps=eps)
    out_ref[...] = _pack3(inv_l, var_l, cov_l)


def _vicreg_feat_core_pallas(f1, f2, *, min_var, eps):
    # Whole-block kernel: assumes the (N, C) features fit in VMEM (true for the (B, C)
    # spatial means and the (b*gamma, C) gathered local features).
    assert f1.shape == f2.shape and f1.ndim == 2
    assert f1.shape[0] > 1, "VICReg variance/covariance need batch size > 1"
    kern = functools.partial(_vicreg_feat_kernel, min_var=min_var, eps=eps)
    out = pl.pallas_call(
        kern,
        out_shape=jax.ShapeDtypeStruct((1, 128), jnp.float32),
        in_specs=[pl.BlockSpec(memory_space=pltpu.MemorySpace.VMEM)] * 2,
        out_specs=pl.BlockSpec(memory_space=pltpu.MemorySpace.VMEM),
    )(f1, f2)
    return out[0, 0], out[0, 1], out[0, 2]


def _vicreg_global_core_pallas(x1, x2, *, min_var, eps):
    """VICReg (inv, var, cov_raw) on (B, C, S) inputs: stream means, then stats kernel."""
    assert x1.shape == x2.shape
    B, C, S = x1.shape
    assert B > 1, "VICReg variance/covariance need batch size > 1"
    f1, f2 = _spatial_mean_pallas(x1, x2)
    return _vicreg_feat_core_pallas(f1, f2, min_var=min_var, eps=eps)


# ---------------------------------------------------------------------------
# Pure-JAX reference core (mirrors the PyTorch module exactly)
# ---------------------------------------------------------------------------

def _vicreg_core_ref(f1, f2, *, min_var, eps):
    def variance_loss(X):
        reg_std = jnp.sqrt(jnp.var(X, axis=0, ddof=1) + eps)
        return jnp.mean(jnp.maximum(min_var - reg_std, 0.0))

    def covariance_loss(X):
        Xc = X - X.mean(0)
        cov = Xc.T @ Xc / (X.shape[0] - 1)
        off = cov - jnp.diag(jnp.diag(cov))
        return jnp.sum(off ** 2) / X.shape[1]

    inv = jnp.mean((f1 - f2) ** 2)
    var = (variance_loss(f1) + variance_loss(f2)) / 2
    cov = (covariance_loss(f1) + covariance_loss(f2)) / 2
    return inv, var, cov


# ---------------------------------------------------------------------------
# Module-level forward passes
# ---------------------------------------------------------------------------

def _vicreg_core_any(X1, X2, *, min_var, eps, use_pallas):
    assert X1.shape == X2.shape
    if X1.ndim > 2:
        B, C = X1.shape[:2]
        x1 = X1.reshape(B, C, -1)          # native dtype, no f32 copy in HBM
        x2 = X2.reshape(B, C, -1)
        if use_pallas:
            return _vicreg_global_core_pallas(x1, x2, min_var=min_var, eps=eps)
        f1 = x1.astype(jnp.float32).mean(-1)
        f2 = x2.astype(jnp.float32).mean(-1)
        return _vicreg_core_ref(f1, f2, min_var=min_var, eps=eps)
    if use_pallas:
        return _vicreg_feat_core_pallas(X1, X2, min_var=min_var, eps=eps)
    return _vicreg_core_ref(X1.astype(jnp.float32), X2.astype(jnp.float32),
                            min_var=min_var, eps=eps)


def vicreg_forward(X1, X2, *, min_var=1.0, eps=1e-4, lam=25.0, mu=25.0, nu=0.1,
                   use_pallas=True):
    """VICRegLoss.forward: returns (lam*inv, mu*var, nu*cov)."""
    inv_l, var_l, cov_l = _vicreg_core_any(X1, X2, min_var=min_var, eps=eps,
                                           use_pallas=use_pallas)
    return lam * inv_l, mu * var_l, nu * cov_l


def _get_sparse_coords(spatial_shape):
    grids = jnp.meshgrid(*[jnp.arange(s, dtype=jnp.float32) for s in spatial_shape],
                         indexing="ij")
    return jnp.stack([g.reshape(-1) for g in grids], axis=1)          # (P, ndim) f32


def _transform_coords(coords, box):
    nd = box.shape[-1] // 2
    a = box[:, None, :nd]
    b = box[:, None, nd:]
    size = b - a
    return coords[None, :, :] * size + a                               # (B, P, nd)


def _cdist(a, b):
    """Pairwise Euclidean distances via the Gram form (MXU-friendly, no (B,P,Q,d) blowup)."""
    a2 = jnp.sum(a * a, axis=-1)[:, :, None]
    b2 = jnp.sum(b * b, axis=-1)[:, None, :]
    ab = jnp.einsum("bpd,bqd->bpq", a, b, preferred_element_type=jnp.float32)
    d2 = jnp.maximum(a2 + b2 - 2.0 * ab, 0.0)
    return jnp.sqrt(d2)                                                # (B, P, Q)


def vicreg_local_forward(X1, X2, box_X1, box_X2, *, min_var=1.0, eps=1e-4,
                         lam=25.0, mu=25.0, nu=0.1, gamma=10, alpha=0.9,
                         use_pallas=True):
    """VICRegLocalLoss.forward: returns (lam*inv*alpha, mu*var*alpha, nu*cov*alpha, local)."""
    assert X1.shape[0] == X2.shape[0], "X1 and X2 need to have the same batch size"
    assert X1.shape == X2.shape

    # global VICReg term on spatially-averaged features (streamed Pallas kernel)
    inv_l, var_l, cov_l = _vicreg_core_any(X1, X2, min_var=min_var, eps=eps,
                                           use_pallas=use_pallas)

    sc1 = _get_sparse_coords(X1.shape[2:])
    sc2 = _get_sparse_coords(X2.shape[2:])

    def feat_vicreg(f1, f2):
        if use_pallas:
            return _vicreg_feat_core_pallas(f1, f2, min_var=min_var, eps=eps)
        return _vicreg_core_ref(f1.astype(jnp.float32), f2.astype(jnp.float32),
                                min_var=min_var, eps=eps)

    # TODO(synk): data-dependent top-k + gather has no clean Pallas equivalent; kept in XLA.
    def local_loss(A, Bv, all_dists):
        b = A.shape[0]
        p2 = all_dists.shape[2]
        flat = all_dists.reshape(b, -1)
        _, idxs = lax.top_k(flat, gamma)                # largest-k, matches torch.topk default
        idx0 = (idxs // p2).reshape(-1)                 # first unraveled coord (used for BOTH
                                                        # views, exactly like the reference)
        batch_idx = jnp.repeat(jnp.arange(b), gamma)
        ca = sc1[idx0].astype(jnp.int32)
        cb = sc2[idx0].astype(jnp.int32)
        al = jnp.moveaxis(A, 1, -1)                     # (B, *spatial, C)
        bl = jnp.moveaxis(Bv, 1, -1)
        fa = al[(batch_idx,) + tuple(ca[:, i] for i in range(ca.shape[1]))]   # (b*gamma, C)
        fb = bl[(batch_idx,) + tuple(cb[:, i] for i in range(cb.shape[1]))]
        i_l, v_l, c_l = feat_vicreg(fa, fb)
        vrl = v_l + c_l / gamma + i_l                   # sum(vicreg_loss(..., adj=gamma))
        return vrl / gamma

    def location_local_loss(A, Bv, boxA, boxB):
        coords_a = _transform_coords(sc1, boxA)
        coords_b = _transform_coords(sc2, boxB)
        return local_loss(A, Bv, _cdist(coords_a, coords_b))

    def feature_local_loss(A, Bv):
        fa = A.reshape(A.shape[0], A.shape[1], -1).swapaxes(1, 2).astype(jnp.float32)
        fb = Bv.reshape(Bv.shape[0], Bv.shape[1], -1).swapaxes(1, 2).astype(jnp.float32)
        return local_loss(A, Bv, _cdist(fa, fb))

    short_range = (location_local_loss(X1, X2, box_X1, box_X2) +
                   location_local_loss(X2, X1, box_X2, box_X1)) / 2
    long_range = (feature_local_loss(X1, X2) + feature_local_loss(X2, X1)) / 2
    local = (short_range + long_range) * (1.0 - alpha)

    return lam * inv_l * alpha, mu * var_l * alpha, nu * cov_l * alpha, local


# ---------------------------------------------------------------------------
# Self-test
# ---------------------------------------------------------------------------

if __name__ == "__main__":
    key = jax.random.PRNGKey(0)
    k1, k2, k3, k4 = jax.random.split(key, 4)
    B, C, H, W = 2, 4, 16, 16
    gamma = 10

    X1 = jax.random.normal(k1, (B, C, H, W), dtype=jnp.float32)
    X2 = jax.random.normal(k2, (B, C, H, W), dtype=jnp.float32)
    box_X1 = jnp.array([[0.0, 0.0, 16.0, 16.0], [1.0, 2.0, 17.0, 18.0]], dtype=jnp.float32)
    box_X2 = jnp.array([[2.0, 0.0, 18.0, 16.0], [0.0, 1.0, 16.0, 17.0]], dtype=jnp.float32)

    # Full VICRegLocalLoss forward (Pallas kernels for every VICReg statistic).
    out_pallas = vicreg_local_forward(X1, X2, box_X1, box_X2, gamma=gamma, use_pallas=True)
    jax.block_until_ready(out_pallas)
    out_ref = vicreg_local_forward(X1, X2, box_X1, box_X2, gamma=gamma, use_pallas=False)
    for a, r in zip(out_pallas, out_ref):
        np.testing.assert_allclose(np.asarray(a), np.asarray(r), rtol=1e-4, atol=1e-5)

    # Plain (global) VICRegLoss forward path as well.
    g_pallas = vicreg_forward(X1, X2, use_pallas=True)
    jax.block_until_ready(g_pallas)
    g_ref = vicreg_forward(X1, X2, use_pallas=False)
    for a, r in zip(g_pallas, g_ref):
        np.testing.assert_allclose(np.asarray(a), np.asarray(r), rtol=1e-4, atol=1e-5)

    # Exercise the multi-step, tail-masked, multi-B-block streaming path with forced tiles.
    Xa = jax.random.normal(k3, (4, 5, 180), dtype=jnp.float32)
    Xb = jax.random.normal(k4, (4, 5, 180), dtype=jnp.float32)
    f1p, f2p = _spatial_mean_pallas(Xa, Xb, tile_b=2, tile_s=128)
    jax.block_until_ready((f1p, f2p))
    np.testing.assert_allclose(np.asarray(f1p), np.asarray(Xa.mean(-1)), rtol=1e-5, atol=1e-5)
    np.testing.assert_allclose(np.asarray(f2p), np.asarray(Xb.mean(-1)), rtol=1e-5, atol=1e-5)

    print("KERNEL_OK")
</pallas_src>

<mosaic_0001>
module attributes {stable_mosaic.version = 11 : i64} {
  func.func @_spatial_sum_kernel(%arg0: i32, %arg1: i32, %arg2: memref<1x4x256xf32, #tpu.memory_space<vmem>>, %arg3: memref<1x4x256xf32, #tpu.memory_space<vmem>>, %arg4: memref<1x1x4xf32, #tpu.memory_space<vmem>>, %arg5: memref<1x1x4xf32, #tpu.memory_space<vmem>>) attributes {dimension_semantics = [#tpu.dimension_semantics<parallel>, #tpu.dimension_semantics<arbitrary>], iteration_bounds = array<i64: 2, 1>, scalar_prefetch = 0 : i64, scratch_operands = 0 : i64, tpu.core_type = #tpu.core_type<tc>, window_params = [{transform_indices = @transform_0, window_bounds = array<i64: 1, 4, 256>}, {transform_indices = @transform_1, window_bounds = array<i64: 1, 4, 256>}, {transform_indices = @transform_2, window_bounds = array<i64: 1, 1, 4>}, {transform_indices = @transform_3, window_bounds = array<i64: 1, 1, 4>}]} {
    %c0_i32 = arith.constant 0 : i32
    %0 = arith.cmpi eq, %arg1, %c0_i32 : i32
    %1 = arith.extui %0 : i1 to i32
    %c0_i32_0 = arith.constant 0 : i32
    %2 = arith.cmpi ne, %1, %c0_i32_0 : i32
    scf.if %2 {
      %cst_19 = arith.constant 0.000000e+00 : f32
      %15 = vector.broadcast %cst_19 : f32 to vector<1x1x4xf32>
      %c0_20 = arith.constant 0 : index
      %c0_21 = arith.constant 0 : index
      %c0_22 = arith.constant 0 : index
      %16 = vector.load %arg4[%c0_20, %c0_21, %c0_22] : memref<1x1x4xf32, #tpu.memory_space<vmem>>, vector<1x1x4xf32>
      tpu.vector_store %arg4[%c0_20, %c0_21, %c0_22], %15 {strides = array<i32>} : memref<1x1x4xf32, #tpu.memory_space<vmem>>, vector<1x1x4xf32>,
      %cst_23 = arith.constant 0.000000e+00 : f32
      %17 = vector.broadcast %cst_23 : f32 to vector<1x1x4xf32>
      %c0_24 = arith.constant 0 : index
      %c0_25 = arith.constant 0 : index
      %c0_26 = arith.constant 0 : index
      %18 = vector.load %arg5[%c0_24, %c0_25, %c0_26] : memref<1x1x4xf32, #tpu.memory_space<vmem>>, vector<1x1x4xf32>
      tpu.vector_store %arg5[%c0_24, %c0_25, %c0_26], %17 {strides = array<i32>} : memref<1x1x4xf32, #tpu.memory_space<vmem>>, vector<1x1x4xf32>,
    } else {
    }
    %c0 = arith.constant 0 : index
    %c0_1 = arith.constant 0 : index
    %c0_2 = arith.constant 0 : index
    %3 = vector.load %arg2[%c0, %c0_1, %c0_2] : memref<1x4x256xf32, #tpu.memory_space<vmem>>, vector<1x4x256xf32>
    %c0_3 = arith.constant 0 : index
    %c0_4 = arith.constant 0 : index
    %c0_5 = arith.constant 0 : index
    %4 = vector.load %arg3[%c0_3, %c0_4, %c0_5] : memref<1x4x256xf32, #tpu.memory_space<vmem>>, vector<1x4x256xf32>
    %c0_6 = arith.constant 0 : index
    %c0_7 = arith.constant 0 : index
    %c0_8 = arith.constant 0 : index
    %5 = vector.load %arg4[%c0_6, %c0_7, %c0_8] : memref<1x1x4xf32, #tpu.memory_space<vmem>>, vector<1x1x4xf32>
    %cst = arith.constant dense<0.000000e+00> : vector<1x4xf32>
    %6 = vector.multi_reduction <add>, %3, %cst [2] : vector<1x4x256xf32> to vector<1x4xf32>
    %7 = vector.shape_cast %6 : vector<1x4xf32> to vector<1x1x4xf32>
    %8 = arith.addf %5, %7 : vector<1x1x4xf32>
    %c0_9 = arith.constant 0 : index
    %c0_10 = arith.constant 0 : index
    %c0_11 = arith.constant 0 : index
    %9 = vector.load %arg4[%c0_9, %c0_10, %c0_11] : memref<1x1x4xf32, #tpu.memory_space<vmem>>, vector<1x1x4xf32>
    tpu.vector_store %arg4[%c0_9, %c0_10, %c0_11], %8 {strides = array<i32>} : memref<1x1x4xf32, #tpu.memory_space<vmem>>, vector<1x1x4xf32>,
    %c0_12 = arith.constant 0 : index
    %c0_13 = arith.constant 0 : index
    %c0_14 = arith.constant 0 : index
    %10 = vector.load %arg5[%c0_12, %c0_13, %c0_14] : memref<1x1x4xf32, #tpu.memory_space<vmem>>, vector<1x1x4xf32>
    %cst_15 = arith.constant dense<0.000000e+00> : vector<1x4xf32>
    %11 = vector.multi_reduction <add>, %4, %cst_15 [2] : vector<1x4x256xf32> to vector<1x4xf32>
    %12 = vector.shape_cast %11 : vector<1x4xf32> to vector<1x1x4xf32>
    %13 = arith.addf %10, %12 : vector<1x1x4xf32>
    %c0_16 = arith.constant 0 : index
    %c0_17 = arith.constant 0 : index
    %c0_18 = arith.constant 0 : index
    %14 = vector.load %arg5[%c0_16, %c0_17, %c0_18] : memref<1x1x4xf32, #tpu.memory_space<vmem>>, vector<1x1x4xf32>
    tpu.vector_store %arg5[%c0_16, %c0_17, %c0_18], %13 {strides = array<i32>} : memref<1x1x4xf32, #tpu.memory_space<vmem>>, vector<1x1x4xf32>,
    return
  }
  func.func @transform_0(%arg0: i32, %arg1: i32) -> (i32, i32, i32) {
    %c0_i32 = arith.constant 0 : i32
    %c0_i32_0 = arith.constant 0 : i32
    return %arg0, %c0_i32, %arg1 : i32, i32, i32
  }
  func.func @transform_1(%arg0: i32, %arg1: i32) -> (i32, i32, i32) {
    %c0_i32 = arith.constant 0 : i32
    %c0_i32_0 = arith.constant 0 : i32
    return %arg0, %c0_i32, %arg1 : i32, i32, i32
  }
  func.func @transform_2(%arg0: i32, %arg1: i32) -> (i32, i32, i32) {
    %c0_i32 = arith.constant 0 : i32
    %c0_i32_0 = arith.constant 0 : i32
    %c0_i32_1 = arith.constant 0 : i32
    return %arg0, %c0_i32, %c0_i32_0 : i32, i32, i32
  }
  func.func @transform_3(%arg0: i32, %arg1: i32) -> (i32, i32, i32) {
    %c0_i32 = arith.constant 0 : i32
    %c0_i32_0 = arith.constant 0 : i32
    %c0_i32_1 = arith.constant 0 : i32
    return %arg0, %c0_i32, %c0_i32_0 : i32, i32, i32
  }
}

</mosaic_0001>

<bundles_post_ra>
// kernel: tpu_custom_call.1
= control target key start
LH: loop header
LB: loop body
LE: loop exit
PB: predicated region body
PF: predicated region fallthrough
CT: control target
= control target key end

     0   :  { %9 = vsyncpa [#allocation3], 0  ;;  %s958_s0 = inlined_call_operand.hbm [shape: f32[2,4,256], index: 0, kind: input, shape index: {}]   ;;  %s959_s1 = inlined_call_operand.hbm [shape: f32[2,4,256], index: 1, kind: input, shape index: {}]   ;;  %s960_s2 = inlined_call_operand.hbm [shape: f32[2,1,4], index: 2, kind: output, shape index: {0}]   ;;  %s961_s3 = inlined_call_operand.hbm [shape: f32[2,1,4], index: 3, kind: output, shape index: {1}]  }
   0x1   :  { %11 = vsyncpa [#allocation3 + $0x1], 0 }
   0x2   :  { %12 = vsyncpa [#allocation6], 0 }
   0x3   :  { %14 = vsyncpa [#allocation6 + $0x1], 0 }
   0x4   :  { %15 = vsyncpa [#allocation4], 0 }
   0x5   :  { %17 = vsyncpa [#allocation4 + $0x1], 0 }
   0x6   :  { %18 = vsyncpa [#allocation9], 0 }
   0x7   :  { %20 = vsyncpa [#allocation9 + $0x1], 0  ;;  %s793_s12 = smov 0   ;;  %s795_s13 = smov 0  }
   0x8   :  { %s797_s14 = smov 0   ;;  %s799_s15 = smov 0  }
   0x9   :  { %s801_s16 = smov 0   ;;  %s803_s17 = smov 0  }
   0xa LB: > { %s498_s18 = sadd.s32 4294967295, %s769_s17   ;;  %s499_s19 = sadd.s32 4294967294, %s769_s17   ;;  %s769_s17 = sphi %s803_s17, %s26_s17   ;;  %s765_s16 = sphi %s801_s16, %s970_s16   ;;  %s761_s15 = sphi %s799_s15, %s969_s15   ;;  %s757_s14 = sphi %s797_s14, %s968_s14   ;;  %s753_s13 = sphi %s795_s13, %s967_s13   ;;  %s749_s12 = sphi %s793_s12, %s966_s12  }
   0xb   : > { %s38_s20 = sadd.s32 1, %s765_s16  ;;  %s47_s21 = sadd.s32 1, %s757_s14 }
   0xc   : > { %p40_p0 = scmp.ge.s32.totalorder %s38_s20, 2  ;;  %p54_p1 = scmp.ne.s32.totalorder %s757_s14, %s753_s13 }
   0xd   : > { %p55_p2 = scmp.eq.s32.totalorder %s769_s17, 0  ;;  %p60_p3 = scmp.ne.s32.totalorder %s753_s13, %s749_s12 }
   0xe   : > { %s972_s20 = smov (%p40_p0, %s38_s20), 0  ;;  %p61_p5 = scmp.eq.s32.totalorder %s498_s18, 0 }
   0xf   : > { %p834_p4 = por %p55_p2, %p54_p1  ;;  %s42_s23 = ssub.s32 %s765_s16, %s972_s20 }
  0x10   : > { %p112_p6 = scmp.eq.s32.totalorder %s498_s18, 1  ;;  %p45_p7 = scmp.eq.s32.totalorder %s42_s23, 0 }
  0x11   : > { %p840_p8 = por %p61_p5, %p60_p3  ;;  %p118_p10 = scmp.eq.s32.totalorder %s499_s19, 1 }
  0x12   : > { %p844_p9 = por %p112_p6, %p54_p1  ;;  %p501_p12 = scmp.ge.s32.totalorder %s769_s17, 2 }
  0x13   : > { %s849_s26 = scalar_select %p45_p7, %s757_s14, %s47_s21  }
  0x14   : > { %p851_p11 = por %p118_p10, %p60_p3  ;;  %p537_p13 = scmp.lt.s32.totalorder %s769_s17, 2 }
  0x15   : > { %s164_s28 = sand.u32 1, %s757_s14   ;;  %s513_s30 = sshll.u32 %s765_s16, 3 }
  0x16   : > { %s502_s29 = sshll.u32 %s164_s28, 3  ;;  %s175_s6 = scalar_lea.hbm %s958_s0, %s513_s30 }
  0x17   : > { %s168_s7 = scalar_lea.vmem [#allocation2], %s502_s29  ;;  %s177_s9 = sshll.u32 %s175_s6, 4  ;;  %s178_s9 = int_to_ptr.hbm [resolvable:$true] %s177_s9 }
  0x18   : > { %s179_s8 = sshll.u32 %s168_s7, 4  ;;  %p524_p0 = pnand %p537_p13, %p834_p4  ;;  %s180_s8 = int_to_ptr.vmem [resolvable:$true] %s179_s8 }
  0x19   : > { %p508_p1 = scmp.ge.s32.totalorder %s769_s17, 1  ;;  %p206_p2 = scmp.lt.s32.totalorder %s769_s17, 3 }
  0x1a   : > { %s165_s10 = scalar_lea.sflag [#allocation3], %s164_s28  ;;  %s197_s19 = scalar_lea.hbm %s959_s1, %s513_s30 }
  0x1b   : > { %526 = dma.hbm_to_vmem [thread:$0]  (!%p524_p0), %s178_s9, 128, %s180_s8, %s165_s10  }
  0x1c   : > { %p207_p3 = pnand %p508_p1, %p206_p2  ;;  %s190_s21 = scalar_lea.vmem [#allocation5], %s502_s29 }
  0x1d   : > { %s201_s23 = sshll.u32 %s190_s21, 4  ;;  %s199_s4 = sshll.u32 %s197_s19, 4  ;;  %s202_s23 = int_to_ptr.vmem [resolvable:$true] %s201_s23  ;;  %s200_s4 = int_to_ptr.hbm [resolvable:$true] %s199_s4 }
  0x1e   : > { %s187_s5 = scalar_lea.sflag [#allocation6], %s164_s28  ;;  %210 = sbr.rel (%p207_p3) target bundleno = 441 (0x1b9), region = 28 }
  0x1f   : > { %529 = dma.hbm_to_vmem [thread:$0]  (!%p524_p0), %s200_s4, 128, %s202_s23, %s187_s5  }
  0x20   : > { %s870_s22 = sand.u32 (!%p207_p3), 1, %s753_s13  }
  0x21   : > { %s509_s6 = sshll.u32 (!%p207_p3), %s870_s22, 3  ;;  %s213_s7 = scalar_lea.sflag (!%p207_p3), [#allocation3], %s870_s22 }
  0x22   : > { %s216_s8 = scalar_lea.vmem (!%p207_p3), [#allocation2], %s509_s6 }
  0x23   : > { %732 = dma.done.wait (%p840_p8), %s213_s7, 128  }
  0x24   : > { %734 = vsyncadd (%p840_p8), %s213_s7, 4294967168  ;;  %s223_s29 = scalar_lea.sflag [#allocation6], %s870_s22  ;;  %s226_s28 = scalar_lea.vmem [#allocation5], %s509_s6 }
  0x25   : > { %736 = dma.done.wait (%p840_p8), %s223_s29, 128  }
  0x26   : > { %738 = vsyncadd (%p840_p8), %s223_s29, 4294967168  ;;  %v267_v0 = vld [vmem:[%s216_s8] sm:$0xff]  ;;  %vm276_vm0 = vcmask 1043456   ;;  %v771_v6 = vmov 0   ;;  %vm264_vm1 = vcmask 24576   ;;  %s886_s30 = scalar_lea.vmem [#allocation7], %s870_s22  ;;  %v298_v20 = vlaneseq  ;;  %s350_s11 = scalar_lea.hbm %s960_s2, %s761_s15 }
  0x27   : > { %271 = vst [vmem:[#allocation1] ss:$2 sm:$0xff] %v267_v0  ;;  %589 = vset.pattern.permute.xlu1 %v771_v6  ;;  %590 = vset.pattern.permute.xlu0 %v771_v6  ;;  %v772_v7 = vmov 0.0   ;;  %v268_v13 = vld [vmem:[%s226_s28] sm:$0xff]  ;;  %s893_s24 = scalar_lea.vmem [#allocation8], %s870_s22  ;;  %s352_s18 = sshll.u32 %s886_s30, 4  ;;  %s353_s18 = int_to_ptr.vmem [resolvable:$true] %s352_s18 }
  0x28   : > { %265 = vst.msk [vmem:[%s886_s30] sm:$0x1] %vm264_vm1, %v772_v7  ;;  %v299_v21 = vand.u32 127, %v298_v20  ;;  %s354_s19 = sshll.u32 %s350_s11, 4  ;;  %s338_s21 = scalar_lea.sflag [#allocation4], %s870_s22  ;;  %s355_s19 = int_to_ptr.hbm [resolvable:$true] %s354_s19 }
  0x29   : > { %266 = vst.msk [vmem:[%s893_s24] sm:$0x1] %vm264_vm1, %v772_v7  ;;  %s665_s23 = sshra.s32 %s355_s19, 4  ;;  %s671_s7 = scalar_lea.hbm %s960_s2, 2  ;;  %s666_s23 = int_to_ptr.hbm [resolvable:$true] %s665_s23 }
  0x2a   : > { %s667_s4 = scalar_lea.hbm %s666_s23, 1  ;;  %p672_p7 = scmp.lt.s32.totalorder %s666_s23, %s960_s2 }
  0x2b   : > { %p668_p4 = scmp.ne.s32.totalorder %s666_s23, %s667_s4  ;;  %p673_p8 = scmp.lt.s32.totalorder %s671_s7, %s667_s4 }
  0x2d   : > { %p669_p5 = pnand %p668_p4, %p844_p9  ;;  %p674_p10 = por %p673_p8, %p672_p7 }
  0x2e   : > { %v272_v1 = vld.sshfl [vmem:[#allocation1] sm:$0xff pattern:$0x75316420]  ;;  %v273_v2 = vld.sshfl [vmem:[#allocation1 + $0x8] sm:$0xff pattern:$0x75316420] }
  0x2f   : > { %v277_v3 = vsel %vm276_vm0, %v272_v1, 0.0  ;;  %v278_v4 = vsel %vm276_vm0, %v273_v2, 0.0  ;;  %v269_v23 = vld [vmem:[%s886_s30] sm:$0x1]  ;;  %p670_p6 = pneg %p669_p5 }
  0x30   : > { %v279_v5 = vadd.f32 %v278_v4, %v277_v3 }
  0x31   : > { %p675_p13 = pnand %p674_p10, %p670_p6 }
  0x32   : > { %280 = vadd.xlane.f32.xlu0 %v279_v5 }
  0xa5   : > { %v281_v8 = vpop.xlane.xlu0 %280 }
  0xa6   : > { %v283_v9 = vperm.slane %v281_v8, 0  ;;  %v284_v10 = vperm.slane %v281_v8, 1  ;;  %v285_v11 = vperm.slane %v281_v8, 2  ;;  %v286_v12 = vperm.slane %v281_v8, 3 }
  0xa8   : > { %287 = vst [vmem:[#allocation1] ss:$9 sm:$0xff] %v283_v9 }
  0xa9   : > { %289 = vst [vmem:[#allocation1 + $0x1] ss:$9 sm:$0xff] %v284_v10 }
  0xaa   : > { %291 = vst [vmem:[#allocation1 + $0x2] ss:$9 sm:$0xff] %v285_v11 }
  0xab   : > { %293 = vst [vmem:[#allocation1 + $0x3] ss:$9 sm:$0xff] %v286_v12 }
  0xb2   : > { %v294_v14 = vld [vmem:[#allocation1] sm:$0xff] }
  0xb3   : > { %296 = vperm.xlu1 %589, %v294_v14   ;;  %307 = vst [vmem:[#allocation1] ss:$2 sm:$0xff] %v268_v13 }
  0xba   : > { %v308_v15 = vld.sshfl [vmem:[#allocation1] sm:$0xff pattern:$0x75316420]  ;;  %v309_v16 = vld.sshfl [vmem:[#allocation1 + $0x8] sm:$0xff pattern:$0x75316420] }
  0xbb   : > { %v312_v17 = vsel %vm276_vm0, %v308_v15, 0.0  ;;  %v313_v18 = vsel %vm276_vm0, %v309_v16, 0.0 }
  0xbc   : > { %v314_v19 = vadd.f32 %v313_v18, %v312_v17 }
  0xbe   : > { %315 = vadd.xlane.f32.xlu0 %v314_v19 }
 0x125   : > { %v297_v22 = vpop.permute.xlu1 %296 }
 0x126   : > { %v300_v24 = vperm.slane %v297_v22, %v299_v21 }
 0x128   : > { %v302_v25 = vadd.f32 %v300_v24, %v269_v23 }
 0x12a   : > { %304 = vst.msk [vmem:[%s886_s30] sm:$0x1] %vm264_vm1, %v302_v25 }
 0x131   : > { %v316_v26 = vpop.xlane.xlu0 %315 }
 0x132   : > { %v318_v27 = vperm.slane %v316_v26, 0  ;;  %v319_v28 = vperm.slane %v316_v26, 1  ;;  %v320_v29 = vperm.slane %v316_v26, 2  ;;  %v321_v30 = vperm.slane %v316_v26, 3 }
 0x134   : > { %322 = vst [vmem:[#allocation1] ss:$9 sm:$0xff] %v318_v27 }
 0x135   : > { %324 = vst [vmem:[#allocation1 + $0x1] ss:$9 sm:$0xff] %v319_v28 }
 0x136   : > { %326 = vst [vmem:[#allocation1 + $0x2] ss:$9 sm:$0xff] %v320_v29 }
 0x137   : > { %328 = vst [vmem:[#allocation1 + $0x3] ss:$9 sm:$0xff] %v321_v30 }
 0x138   : > { %678 = shalt.err (!%p675_p13)
}
 0x139   : > { %519 = dma.vmem_to_hbm [thread:$0]  (%p844_p9), %s353_s18, 16, %s355_s19, %s338_s21   ;;  %v305_v33 = vld [vmem:[%s893_s24] sm:$0x1] }
 0x13a   : > { %s363_s9 = scalar_lea.hbm %s961_s3, %s761_s15  ;;  %s365_s10 = sshll.u32 %s893_s24, 4  ;;  %s366_s10 = int_to_ptr.vmem [resolvable:$true] %s365_s10 }
 0x13b   : > { %s367_s11 = sshll.u32 %s363_s9, 4  ;;  %s342_s23 = scalar_lea.sflag [#allocation9], %s870_s22  ;;  %s368_s11 = int_to_ptr.hbm [resolvable:$true] %s367_s11 }
 0x13c   : > { %s693_s4 = sshra.s32 %s368_s11, 4  ;;  %s699_s21 = scalar_lea.hbm %s961_s3, 2  ;;  %s694_s4 = int_to_ptr.hbm [resolvable:$true] %s693_s4 }
 0x13d   : > { %s695_s18 = scalar_lea.hbm %s694_s4, 1  ;;  %p700_p3 = scmp.lt.s32.totalorder %s694_s4, %s961_s3 }
 0x13e   : > { %v329_v31 = vld [vmem:[#allocation1] sm:$0xff]  ;;  %p696_p0 = scmp.ne.s32.totalorder %s694_s4, %s695_s18  ;;  %p701_p4 = scmp.lt.s32.totalorder %s699_s21, %s695_s18 }
 0x13f   : > { %331 = vperm.xlu1 %589, %v329_v31  }
 0x140   : > { %p697_p1 = pnand %p696_p0, %p844_p9  ;;  %p702_p5 = por %p701_p4, %p700_p3 }
 0x142   : > { %p698_p2 = pneg %p697_p1 }
 0x144   : > { %p703_p6 = pnand %p702_p5, %p698_p2 }
 0x1b1   : > { %v332_v32 = vpop.permute.xlu1 %331 }
 0x1b2   : > { %v333_v34 = vperm.slane %v332_v32, %v299_v21 }
 0x1b4   : > { %v335_v35 = vadd.f32 %v333_v34, %v305_v33 }
 0x1b6   : > { %336 = vst.msk [vmem:[%s893_s24] sm:$0x1] %vm264_vm1, %v335_v35 }
 0x1b7   : > { %706 = shalt.err (!%p703_p6)
}
 0x1b8   : > { %520 = dma.vmem_to_hbm [thread:$0]  (%p844_p9), %s366_s10, 16, %s368_s11, %s342_s23  }
 0x1b9 PF: > { %s379_s22 = sand.u32 1, %s749_s12   ;;  %p531_p7 = pnand %p501_p12, %p851_p11 }
 0x1ba   : > { %s380_s24 = scalar_lea.sflag [#allocation4], %s379_s22 }
 0x1bb   : > { %p532_p8 = pneg %p531_p7 }
 0x1bd   : > { %740 = dma.done.wait (%p532_p8), %s380_s24, 16  }
 0x1be   : > { %742 = vsyncadd (%p532_p8), %s380_s24, 4294967280  ;;  %s389_s7 = scalar_lea.sflag [#allocation9], %s379_s22 }
 0x1bf   : > { %744 = dma.done.wait (%p532_p8), %s389_s7, 16  }
 0x1c0   : > { %746 = vsyncadd (%p532_p8), %s389_s7, 4294967280  ;;  %s26_s17 = sadd.s32 1, %s769_s17   ;;  %s966_s12 = smov %s753_s13 }
 0x1c1   : > { %p23_p10 = scmp.ge.s32.totalorder %s26_s17, 4   ;;  %s967_s13 = smov %s757_s14 }
 0x1c2   : > { %s968_s14 = smov %s849_s26  ;;  %s969_s15 = smov %s765_s16 }
 0x1c3   : > { %s970_s16 = smov %s972_s20  ;;  %25 = sbr.rel (!%p23_p10) target bundleno = 10 (0xa), region = 113 }
 0x1c8   :  { %394 = vsyncpa [#allocation3], 1 }
 0x1c9   :  { %396 = vsyncpa [#allocation3 + $0x1], 1 }
 0x1ca   :  { %397 = vsyncpa [#allocation6], 1 }
 0x1cb   :  { %399 = vsyncpa [#allocation6 + $0x1], 1 }
 0x1cc   :  { %400 = vsyncpa [#allocation4], 1 }
 0x1cd   :  { %402 = vsyncpa [#allocation4 + $0x1], 1 }
 0x1ce   :  { %403 = vsyncpa [#allocation9], 1 }
 0x1cf   :  { %405 = vsyncpa [#allocation9 + $0x1], 1 }

</bundles_post_ra>
